<compile_context>
chip_gen: v6e
topology: v6e:2x2x1
jax: 0.10.0
libtpu: 0.0.40
codegen_flags: <defaults>
</compile_context>

<pallas_src>
import functools

import numpy as np
import jax
import jax.numpy as jnp
from jax.experimental import pallas as pl
from jax.experimental.pallas import tpu as pltpu

EPS = 1e-6


def _round_up(x, m):
    return ((x + m - 1) // m) * m


def _layernorm(v, gamma, beta, inv_n):
    """LayerNorm over the (full, unpadded) last dim.

    var = E[v^2] - mean^2: the two lane reductions are independent so they can
    overlap on the XLU; clamped at 0 to guard against f32 cancellation.
    """
    mean = jnp.sum(v, axis=-1, keepdims=True) * inv_n
    ex2 = jnp.sum(v * v, axis=-1, keepdims=True) * inv_n
    var = jnp.maximum(ex2 - mean * mean, 0.0)
    return (v - mean) * jax.lax.rsqrt(var + EPS) * gamma + beta


def _dct_block_kernel(x_ref, wf_ref, w2t_ref, gb_ref, o_ref, *, inv_l):
    x = x_ref[...].astype(jnp.float32)                       # (tm, L) f32

    # Fused DCT-II + Linear(L->2L) + ReLU: basis folded into the bf16 weight.
    h = jnp.dot(x.astype(jnp.bfloat16), wf_ref[...],
                preferred_element_type=jnp.float32)           # (tm, 2L), f32 acc
    h = jnp.maximum(h, 0.0)

    # Linear(2L->L) + Sigmoid (fc dropout is identity in eval mode).
    lr = jax.nn.sigmoid(
        jnp.dot(h.astype(jnp.bfloat16), w2t_ref[...],
                preferred_element_type=jnp.float32))          # (tm, L)

    gb = gb_ref[...]                                          # (2, L) f32
    gamma = gb[0:1, :]
    beta = gb[1:2, :]

    # lr_weight = LayerNorm(lr_weight)
    lr = _layernorm(lr, gamma, beta, inv_l)
    # x = x + dropout(x * lr_weight)   (dropout(0.2) is identity in eval mode)
    y = x + x * lr
    # return LayerNorm(x)
    o_ref[...] = _layernorm(y, gamma, beta, inv_l).astype(o_ref.dtype)


def prepare_dct_block_params(w1, w2, gamma, beta):
    """One-time host-side prep: DCT basis, fc1 fusion, transpose, bf16 weights."""
    l = int(np.shape(gamma)[0])          # 96 (forced by nn.LayerNorm([96]))

    # DCT-II (norm=None) basis: D[n, k] = 2*cos(pi*(2n+1)*k / (2L))
    n = np.arange(l, dtype=np.float64)[:, None]
    k = np.arange(l, dtype=np.float64)[None, :]
    dct_mat = 2.0 * np.cos(np.pi * (2.0 * n + 1.0) * k / (2.0 * l))

    # Fuse DCT into fc1:  x @ D @ W1^T  ==  x @ (D @ W1^T)
    wf = dct_mat @ np.asarray(np.array(w1), dtype=np.float64).T        # (L, 2L)
    w2t = np.asarray(np.array(w2), dtype=np.float64).T                 # (2L, L)

    gb = jnp.stack([jnp.asarray(gamma, jnp.float32),
                    jnp.asarray(beta, jnp.float32)], axis=0)           # (2, L)

    return dict(
        wf=jnp.asarray(wf, jnp.float32).astype(jnp.bfloat16),   # bf16 MXU operand
        w2t=jnp.asarray(w2t, jnp.float32).astype(jnp.bfloat16),
        gb=gb,
        l=l,
    )


@functools.partial(jax.jit, static_argnames=("block_rows",))
def _dct_channel_block_call(x, wf, w2t, gb, *, block_rows):
    bsz, c, l = x.shape
    m = bsz * c
    x2 = x.reshape(m, l)                 # no pad / no dtype change -> no extra HBM pass

    # Rows per grid step: balanced split, multiple of 8 sublanes; force >= 2 grid
    # steps when there is enough work so both of v7x's TensorCores get a share.
    n_blocks = pl.cdiv(m, block_rows)
    if m >= 16 and n_blocks < 2:
        n_blocks = 2
    tm = min(_round_up(pl.cdiv(m, n_blocks), 8), _round_up(m, 8))
    grid = (pl.cdiv(m, tm),)             # trailing partial block: OOB writes masked

    kernel = functools.partial(_dct_block_kernel, inv_l=1.0 / l)

    out = pl.pallas_call(
        kernel,
        out_shape=jax.ShapeDtypeStruct((m, l), x2.dtype),
        grid=grid,
        in_specs=[
            pl.BlockSpec((tm, l), lambda i: (i, 0)),       # x row block (streamed)
            pl.BlockSpec((l, 2 * l), lambda i: (0, 0)),    # fused DCT+W1^T (resident, bf16)
            pl.BlockSpec((2 * l, l), lambda i: (0, 0)),    # W2^T (resident, bf16)
            pl.BlockSpec((2, l), lambda i: (0, 0)),        # [gamma; beta] (resident)
        ],
        out_specs=pl.BlockSpec((tm, l), lambda i: (i, 0)),
        compiler_params=pltpu.CompilerParams(
            dimension_semantics=("parallel",),   # row blocks shard across TCs (v7x)
        ),
    )(x2, wf, w2t, gb)

    return out.reshape(bsz, c, l)


def dct_channel_block_forward(x, params, block_rows=1024):
    """x: (B, C, L); params from prepare_dct_block_params. Eval-mode forward."""
    assert x.shape[-1] == params["l"]
    return _dct_channel_block_call(x, params["wf"], params["w2t"], params["gb"],
                                   block_rows=block_rows)


# --------------------------- pure-JAX references ---------------------------

def _layernorm_ref(v, gamma, beta):
    mean = jnp.mean(v, axis=-1, keepdims=True)
    var = jnp.mean((v - mean) ** 2, axis=-1, keepdims=True)
    return (v - mean) * jax.lax.rsqrt(var + EPS) * gamma + beta


def reference_forward(x, w1, w2, gamma, beta):
    """Mirrors the PyTorch module in eval mode (f32, unfused, exact DCT)."""
    _, _, l = x.shape
    n = jnp.arange(l, dtype=jnp.float32)[:, None]
    k = jnp.arange(l, dtype=jnp.float32)[None, :]
    D = 2.0 * jnp.cos(jnp.pi * (2.0 * n + 1.0) * k / (2.0 * l))
    freq = jnp.einsum("bcl,lk->bck", x, D)
    h = jax.nn.relu(jnp.einsum("bck,dk->bcd", freq, w1))
    lr = jax.nn.sigmoid(jnp.einsum("bcd,kd->bck", h, w2))
    lr = _layernorm_ref(lr, gamma, beta)
    y = x + x * lr
    return _layernorm_ref(y, gamma, beta)


def matched_reference_forward(x, params):
    """Pure-JAX mirror of the kernel numerics (same fused bf16 weights, same LN)."""
    b, c, l = x.shape
    x2 = x.reshape(-1, l).astype(jnp.float32)
    gamma = params["gb"][0:1, :]
    beta = params["gb"][1:2, :]
    inv_l = 1.0 / l
    h = jnp.maximum(jnp.dot(x2.astype(jnp.bfloat16), params["wf"],
                            preferred_element_type=jnp.float32), 0.0)
    lr = jax.nn.sigmoid(jnp.dot(h.astype(jnp.bfloat16), params["w2t"],
                                preferred_element_type=jnp.float32))
    lr = _layernorm(lr, gamma, beta, inv_l)
    y = x2 + x2 * lr
    return _layernorm(y, gamma, beta, inv_l).reshape(b, c, l)


if __name__ == "__main__":
    B, C, L = 2, 4, 96  # L fixed at 96 by nn.LayerNorm([96]); fc `channel` arg == L

    key = jax.random.PRNGKey(0)
    kx, k1, k2 = jax.random.split(key, 3)

    x = jax.random.normal(kx, (B, C, L), dtype=jnp.float32)

    # Synthetic parameters matching nn.Linear(L, 2L) / nn.Linear(2L, L) (no bias).
    w1 = jax.random.normal(k1, (2 * L, L), dtype=jnp.float32) * (1.0 / jnp.sqrt(L))
    w2 = jax.random.normal(k2, (L, 2 * L), dtype=jnp.float32) * (1.0 / jnp.sqrt(2 * L))
    gamma = jnp.ones((L,), dtype=jnp.float32)   # LayerNorm default weight
    beta = jnp.zeros((L,), dtype=jnp.float32)   # LayerNorm default bias

    params = prepare_dct_block_params(w1, w2, gamma, beta)  # one-time init-path work

    out = dct_channel_block_forward(x, params)
    out = jax.block_until_ready(out)
    assert out.shape == (B, C, L)
    assert bool(jnp.all(jnp.isfinite(out)))

    # 1) Precision-matched check (same fused bf16 weights, same LN formula):
    #    verifies the Pallas tiling/plumbing is exact.
    matched = matched_reference_forward(x, params)
    assert jnp.allclose(out, matched, rtol=2e-3, atol=2e-3), \
        "Pallas kernel mismatch vs precision-matched reference"

    # 2) Check against the f32, unfused reference mirroring the PyTorch module.
    #    Tolerance covers the bf16 MXU-operand rounding (f32 accumulation keeps it
    #    small) amplified through the sigmoid gate and the two LayerNorms.
    ref = reference_forward(x, w1, w2, gamma, beta)
    assert jnp.allclose(out, ref, rtol=5e-2, atol=5e-2), \
        "Pallas kernel mismatch vs f32 reference"

    print("KERNEL_OK")
</pallas_src>

<mosaic_0001>
module attributes {stable_mosaic.version = 11 : i64} {
  func.func @_dct_block_kernel(%arg0: i32, %arg1: memref<8x96xf32, #tpu.memory_space<vmem>>, %arg2: memref<96x192xbf16, #tpu.memory_space<vmem>>, %arg3: memref<192x96xbf16, #tpu.memory_space<vmem>>, %arg4: memref<2x96xf32, #tpu.memory_space<vmem>>, %arg5: memref<8x96xf32, #tpu.memory_space<vmem>>) attributes {dimension_semantics = [#tpu.dimension_semantics<parallel>], iteration_bounds = array<i64: 1>, scalar_prefetch = 0 : i64, scratch_operands = 0 : i64, tpu.core_type = #tpu.core_type<tc>, window_params = [{transform_indices = @transform_0, window_bounds = array<i64: 8, 96>}, {pipeline_mode = #tpu.pipeline_mode<synchronous>, transform_indices = @transform_1, window_bounds = array<i64: 96, 192>}, {pipeline_mode = #tpu.pipeline_mode<synchronous>, transform_indices = @transform_2, window_bounds = array<i64: 192, 96>}, {pipeline_mode = #tpu.pipeline_mode<synchronous>, transform_indices = @transform_3, window_bounds = array<i64: 2, 96>}, {transform_indices = @transform_4, window_bounds = array<i64: 8, 96>}]} {
    %c0 = arith.constant 0 : index
    %c0_0 = arith.constant 0 : index
    %0 = vector.load %arg1[%c0, %c0_0] : memref<8x96xf32, #tpu.memory_space<vmem>>, vector<8x96xf32>
    %1 = arith.truncf %0 : vector<8x96xf32> to vector<8x96xbf16>
    %c0_1 = arith.constant 0 : index
    %c0_2 = arith.constant 0 : index
    %2 = vector.load %arg2[%c0_1, %c0_2] : memref<96x192xbf16, #tpu.memory_space<vmem>>, vector<96x192xbf16>
    %cst = arith.constant dense<0.000000e+00> : vector<8x192xf32>
    %3 = tpu.matmul %1, %2, %cst {dimension_numbers = #tpu.dot_dimension_numbers<[1], [0], [0], [1], [0, 0, 1, 1], [], []>} : vector<8x96xbf16>, vector<96x192xbf16>, vector<8x192xf32> -> vector<8x192xf32>
    %cst_3 = arith.constant 0.000000e+00 : f32
    %4 = vector.broadcast %cst_3 : f32 to vector<8x192xf32>
    %5 = arith.maximumf %3, %4 : vector<8x192xf32>
    %6 = arith.truncf %5 : vector<8x192xf32> to vector<8x192xbf16>
    %c0_4 = arith.constant 0 : index
    %c0_5 = arith.constant 0 : index
    %7 = vector.load %arg3[%c0_4, %c0_5] : memref<192x96xbf16, #tpu.memory_space<vmem>>, vector<192x96xbf16>
    %cst_6 = arith.constant dense<0.000000e+00> : vector<8x96xf32>
    %8 = tpu.matmul %6, %7, %cst_6 {dimension_numbers = #tpu.dot_dimension_numbers<[1], [0], [0], [1], [0, 0, 1, 1], [], []>} : vector<8x192xbf16>, vector<192x96xbf16>, vector<8x96xf32> -> vector<8x96xf32>
    %9 = arith.negf %8 : vector<8x96xf32>
    %10 = math.exp %9 : vector<8x96xf32>
    %cst_7 = arith.constant 1.000000e+00 : f32
    %11 = vector.broadcast %cst_7 : f32 to vector<8x96xf32>
    %12 = arith.addf %11, %10 : vector<8x96xf32>
    %13 = arith.divf %11, %12 : vector<8x96xf32>
    %c0_8 = arith.constant 0 : index
    %c0_9 = arith.constant 0 : index
    %14 = vector.load %arg4[%c0_8, %c0_9] : memref<2x96xf32, #tpu.memory_space<vmem>>, vector<2x96xf32>
    %15 = vector.extract_strided_slice %14 {offsets = [0, 0], sizes = [1, 96], strides = [1, 1]} : vector<2x96xf32> to vector<1x96xf32>
    %16 = vector.extract_strided_slice %14 {offsets = [1, 0], sizes = [1, 96], strides = [1, 1]} : vector<2x96xf32> to vector<1x96xf32>
    %cst_10 = arith.constant dense<0.000000e+00> : vector<8xf32>
    %17 = vector.multi_reduction <add>, %13, %cst_10 [1] : vector<8x96xf32> to vector<8xf32>
    %18 = vector.shape_cast %17 : vector<8xf32> to vector<8x1xf32>
    %cst_11 = arith.constant 0.010416667 : f32
    %19 = vector.broadcast %cst_11 : f32 to vector<8x1xf32>
    %20 = arith.mulf %18, %19 : vector<8x1xf32>
    %21 = arith.mulf %13, %13 : vector<8x96xf32>
    %cst_12 = arith.constant dense<0.000000e+00> : vector<8xf32>
    %22 = vector.multi_reduction <add>, %21, %cst_12 [1] : vector<8x96xf32> to vector<8xf32>
    %23 = vector.shape_cast %22 : vector<8xf32> to vector<8x1xf32>
    %cst_13 = arith.constant 0.010416667 : f32
    %24 = vector.broadcast %cst_13 : f32 to vector<8x1xf32>
    %25 = arith.mulf %23, %24 : vector<8x1xf32>
    %26 = arith.mulf %20, %20 : vector<8x1xf32>
    %27 = arith.subf %25, %26 : vector<8x1xf32>
    %cst_14 = arith.constant 0.000000e+00 : f32
    %28 = vector.broadcast %cst_14 : f32 to vector<8x1xf32>
    %29 = arith.maximumf %27, %28 : vector<8x1xf32>
    %30 = vector.broadcast %20 : vector<8x1xf32> to vector<8x96xf32>
    %31 = arith.subf %13, %30 : vector<8x96xf32>
    %cst_15 = arith.constant 9.99999997E-7 : f32
    %32 = vector.broadcast %cst_15 : f32 to vector<8x1xf32>
    %33 = arith.addf %29, %32 : vector<8x1xf32>
    %34 = math.rsqrt %33 : vector<8x1xf32>
    %35 = vector.broadcast %34 : vector<8x1xf32> to vector<8x96xf32>
    %36 = arith.mulf %31, %35 : vector<8x96xf32>
    %37 = vector.broadcast %15 : vector<1x96xf32> to vector<8x96xf32>
    %38 = arith.mulf %36, %37 : vector<8x96xf32>
    %39 = vector.broadcast %16 : vector<1x96xf32> to vector<8x96xf32>
    %40 = arith.addf %38, %39 : vector<8x96xf32>
    %41 = arith.mulf %0, %40 : vector<8x96xf32>
    %42 = arith.addf %0, %41 : vector<8x96xf32>
    %cst_16 = arith.constant dense<0.000000e+00> : vector<8xf32>
    %43 = vector.multi_reduction <add>, %42, %cst_16 [1] : vector<8x96xf32> to vector<8xf32>
    %44 = vector.shape_cast %43 : vector<8xf32> to vector<8x1xf32>
    %cst_17 = arith.constant 0.010416667 : f32
    %45 = vector.broadcast %cst_17 : f32 to vector<8x1xf32>
    %46 = arith.mulf %44, %45 : vector<8x1xf32>
    %47 = arith.mulf %42, %42 : vector<8x96xf32>
    %cst_18 = arith.constant dense<0.000000e+00> : vector<8xf32>
    %48 = vector.multi_reduction <add>, %47, %cst_18 [1] : vector<8x96xf32> to vector<8xf32>
    %49 = vector.shape_cast %48 : vector<8xf32> to vector<8x1xf32>
    %cst_19 = arith.constant 0.010416667 : f32
    %50 = vector.broadcast %cst_19 : f32 to vector<8x1xf32>
    %51 = arith.mulf %49, %50 : vector<8x1xf32>
    %52 = arith.mulf %46, %46 : vector<8x1xf32>
    %53 = arith.subf %51, %52 : vector<8x1xf32>
    %cst_20 = arith.constant 0.000000e+00 : f32
    %54 = vector.broadcast %cst_20 : f32 to vector<8x1xf32>
    %55 = arith.maximumf %53, %54 : vector<8x1xf32>
    %56 = vector.broadcast %46 : vector<8x1xf32> to vector<8x96xf32>
    %57 = arith.subf %42, %56 : vector<8x96xf32>
    %cst_21 = arith.constant 9.99999997E-7 : f32
    %58 = vector.broadcast %cst_21 : f32 to vector<8x1xf32>
    %59 = arith.addf %55, %58 : vector<8x1xf32>
    %60 = math.rsqrt %59 : vector<8x1xf32>
    %61 = vector.broadcast %60 : vector<8x1xf32> to vector<8x96xf32>
    %62 = arith.mulf %57, %61 : vector<8x96xf32>
    %63 = vector.broadcast %15 : vector<1x96xf32> to vector<8x96xf32>
    %64 = arith.mulf %62, %63 : vector<8x96xf32>
    %65 = vector.broadcast %16 : vector<1x96xf32> to vector<8x96xf32>
    %66 = arith.addf %64, %65 : vector<8x96xf32>
    %c0_22 = arith.constant 0 : index
    %c0_23 = arith.constant 0 : index
    %67 = vector.load %arg5[%c0_22, %c0_23] : memref<8x96xf32, #tpu.memory_space<vmem>>, vector<8x96xf32>
    tpu.vector_store %arg5[%c0_22, %c0_23], %66 {strides = array<i32>} : memref<8x96xf32, #tpu.memory_space<vmem>>, vector<8x96xf32>,
    return
  }
  func.func @transform_0(%arg0: i32) -> (i32, i32) {
    %c0_i32 = arith.constant 0 : i32
    %c0_i32_0 = arith.constant 0 : i32
    return %arg0, %c0_i32 : i32, i32
  }
  func.func @transform_1(%arg0: i32) -> (i32, i32) {
    %c0_i32 = arith.constant 0 : i32
    %c0_i32_0 = arith.constant 0 : i32
    %c0_i32_1 = arith.constant 0 : i32
    return %c0_i32, %c0_i32_0 : i32, i32
  }
  func.func @transform_2(%arg0: i32) -> (i32, i32) {
    %c0_i32 = arith.constant 0 : i32
    %c0_i32_0 = arith.constant 0 : i32
    %c0_i32_1 = arith.constant 0 : i32
    return %c0_i32, %c0_i32_0 : i32, i32
  }
  func.func @transform_3(%arg0: i32) -> (i32, i32) {
    %c0_i32 = arith.constant 0 : i32
    %c0_i32_0 = arith.constant 0 : i32
    %c0_i32_1 = arith.constant 0 : i32
    return %c0_i32, %c0_i32_0 : i32, i32
  }
  func.func @transform_4(%arg0: i32) -> (i32, i32) {
    %c0_i32 = arith.constant 0 : i32
    %c0_i32_0 = arith.constant 0 : i32
    return %arg0, %c0_i32 : i32, i32
  }
}

</mosaic_0001>

<bundles_post_ra>
// kernel: _dct_channel_block_call.1
= control target key start
LH: loop header
LB: loop body
LE: loop exit
PB: predicated region body
PF: predicated region fallthrough
CT: control target
= control target key end

     0   :  { %9 = vsyncpa [#allocation3], 0  ;;  %s612_s0 = inlined_call_operand.hbm [shape: f32[8,96], index: 0, kind: input, shape index: {}]   ;;  %s613_s1 = inlined_call_operand.hbm [shape: bf16[96,192], index: 1, kind: input, shape index: {}]   ;;  %s614_s2 = inlined_call_operand.hbm [shape: bf16[192,96], index: 2, kind: input, shape index: {}]   ;;  %s615_s3 = inlined_call_operand.vmem [shape: f32[2,96], index: 3, kind: input, shape index: {}]   ;;  %s616_s4 = inlined_call_operand.hbm [shape: f32[8,96], index: 4, kind: output, shape index: {}]  }
   0x1   :  { %10 = vsyncpa [#allocation6], 0 }
   0x2   :  { %11 = vsyncpa [#allocation4], 0  ;;  %s551_s15 = smov [#allocation5]  }
   0x3   :  { %s27_s16 = sshll.u32 %s551_s15, 4  ;;  %s28_s16 = int_to_ptr.vmem [resolvable:$true] %s27_s16 }
   0x4   :  { %s473_s17 = scalar_lea.vmem %s28_s16, 1536  ;;  %p478_p1 = scmp.lt.s32.totalorder %s28_s16, %s28_s16 }
   0x5   :  { %p474_p0 = scmp.ne.s32.totalorder %s28_s16, %s473_s17  ;;  %p479_p2 = scmp.lt.s32.totalorder %s473_s17, %s473_s17 }
   0x7   :  { %p480_p3 = por %p479_p2, %p478_p1 }
   0x9   :  { %p481_p4 = pnand %p480_p3, %p474_p0 }
   0xb   :  { %484 = shalt.err (!%p481_p4)
}
   0xc   :  { %s552_s18 = smov 128   ;;  %s553_s19 = smov 8  }
   0xd   :  { %33 = dma.hbm_to_vmem [thread:$0]  %s613_s1, 1536, %s28_s16, [#allocation6], %s552_s18, %s552_s18, %s553_s19  }
   0xe   :  { %s554_s22 = smov [#allocation2]   ;;  %s555_s24 = smov [#allocation7]  }
   0xf   :  { %s18_s23 = sshll.u32 %s554_s22, 4  ;;  %s39_s25 = sshll.u32 %s555_s24, 4  ;;  %s19_s23 = int_to_ptr.vmem [resolvable:$true] %s18_s23  ;;  %s40_s25 = int_to_ptr.vmem [resolvable:$true] %s39_s25 }
  0x10   :  { %s493_s26 = scalar_lea.vmem %s19_s23, 128  ;;  %p498_p6 = scmp.lt.s32.totalorder %s19_s23, %s19_s23 }
  0x11   :  { %p494_p5 = scmp.ne.s32.totalorder %s19_s23, %s493_s26  ;;  %p499_p7 = scmp.lt.s32.totalorder %s493_s26, %s493_s26 }
  0x13   :  { %p500_p8 = por %p499_p7, %p498_p6 }
  0x15   :  { %p501_p9 = pnand %p500_p8, %p494_p5 }
  0x17   :  { %504 = shalt.err (!%p501_p9)
}
  0x18   :  { %21 = dma.hbm_to_vmem [thread:$0]  %s612_s0, 128, %s19_s23, [#allocation3]  }
  0x19   :  { %s513_s29 = scalar_lea.vmem %s40_s25, 1536  ;;  %p518_p11 = scmp.lt.s32.totalorder %s40_s25, %s40_s25 }
  0x1a   :  { %p514_p10 = scmp.ne.s32.totalorder %s40_s25, %s513_s29  ;;  %p519_p12 = scmp.lt.s32.totalorder %s513_s29, %s513_s29 }
  0x1c   :  { %p520_p13 = por %p519_p12, %p518_p11 }
  0x1e   :  { %p521_p0 = pnand %p520_p13, %p514_p10 }
  0x20   :  { %524 = shalt.err (!%p521_p0)
}
  0x21   :  { %s556_s1 = smov 64   ;;  %s557_s30 = smov 4  }
  0x22   :  { %45 = dma.hbm_to_vmem [thread:$0]  %s614_s2, 1536, %s40_s25, [#allocation6], %s556_s1, %s556_s1, %s557_s30  }
  0x23   :  { %545 = dma.done.wait [#allocation3], 128  }
  0x24   :  { %546 = vsyncadd [#allocation3], 4294967168 }
  0x25   :  { %547 = dma.done.wait [#allocation6], 3072  }
  0x26   :  { %548 = vsyncadd [#allocation6], 4294964224  ;;  %v558_v0 = vmov 0   ;;  %v427_v1 = vld [vmem:[#allocation5 + $0x54] ss:$8 sps:$4 sm:$0xff]   ;;  %v447_v13 = vld [vmem:[#allocation7 + $0x28] sm:$0xff]   ;;  %v344_v54 = vlaneseq }
  0x27   :  { %168 = vmatprep.mubr.bf16.mxu0 %v558_v0  ;;  %281 = vmatprep.subr.bf16.mxu1 %v558_v0  ;;  %v429_v2 = vld [vmem:[#allocation5 + $0x50] ss:$8 sps:$4 sm:$0xff]   ;;  %v430_v3 = vld [vmem:[#allocation5 + $0x44] ss:$8 sps:$4 sm:$0xff]   ;;  %v432_v4 = vld [vmem:[#allocation5 + $0x40] ss:$8 sps:$4 sm:$0xff]  }
  0x28   :  { %140 = vmatprep.subr.bf16.mxu0 %v427_v1  ;;  %v433_v5 = vld [vmem:[#allocation5 + $0x34] ss:$8 sps:$4 sm:$0xff]   ;;  %v435_v6 = vld [vmem:[#allocation5 + $0x30] ss:$8 sps:$4 sm:$0xff]   ;;  %v436_v7 = vld [vmem:[#allocation5 + $0x24] ss:$8 sps:$4 sm:$0xff]  }
  0x29   :  { %141 = vmatpush1.bf16.msra.mxu0 %v429_v2  ;;  %v445_v8 = vld [vmem:[#allocation7 + $0x38] sm:$0xff]   ;;  %v438_v9 = vld [vmem:[#allocation5 + $0x20] ss:$8 sps:$4 sm:$0xff]   ;;  %v446_v10 = vld [vmem:[#allocation7 + $0x30] sm:$0xff]   ;;  %vm132_vm0 = vcmask 785408   ;;  %vm277_vm1 = vcmask 523264  }
  0x2a   :  { %142 = vmatprep.subr.bf16.mxu0 %v430_v3  ;;  %282 = vmatpush1.bf16.msra.mxu1 %v445_v8  ;;  %v439_v11 = vld [vmem:[#allocation5 + $0x14] ss:$8 sps:$4 sm:$0xff]   ;;  %v441_v12 = vld [vmem:[#allocation5 + $0x10] ss:$8 sps:$4 sm:$0xff]   ;;  %v442_v14 = vld [vmem:[#allocation5 + $0x4] ss:$8 sps:$4 sm:$0xff]  }
  0x2b   :  { %283 = vmatprep.subr.bf16.mxu1 %v558_v0  ;;  %v444_v15 = vld [vmem:[#allocation5] ss:$8 sps:$4 sm:$0xff]   ;;  %v594_v16 = vld [vmem:[#allocation2] sm:$0xff]  ;;  %v450_v20 = vld [vmem:[#allocation7 + $0x10] sm:$0xff]   ;;  %v345_v55 = vshrl.u32 %v344_v54, 7 }
  0x2c   :  { %v448_v17 = vld [vmem:[#allocation7 + $0x20] sm:$0xff]   ;;  %v59_v18 = vpack.c.bf16 %v594_v16, %v594_v16  ;;  %v449_v19 = vld [vmem:[#allocation7 + $0x18] sm:$0xff]   ;;  %v451_v21 = vld [vmem:[#allocation7 + $0x8] sm:$0xff]  }
  0x2d   :  { %143 = vmatpush1.bf16.msra.mxu0 %v432_v4  ;;  %v452_v22 = vld [vmem:[#allocation7] sm:$0xff]   ;;  %v453_v23 = vld [vmem:[#allocation7 + $0x58] sm:$0xff]   ;;  %v454_v24 = vld [vmem:[#allocation7 + $0x50] sm:$0xff]   ;;  %v346_v56 = vsub.s32 0, %v345_v55  ;;  %v351_v58 = vsub.s32 1, %v345_v55 }
  0x2e   :  { %144 = vmatprep.subr.bf16.mxu0 %v433_v5  ;;  %284 = vmatpush1.bf16.msra.mxu1 %v446_v10  ;;  %v455_v25 = vld [vmem:[#allocation7 + $0x48] sm:$0xff]   ;;  %v456_v26 = vld [vmem:[#allocation7 + $0x40] sm:$0xff]   ;;  %v327_v57 = vld [vmem:[%s615_s3] sm:$0x3]  ;;  %s559_s3 = smov [#allocation8]  }
  0x2f   :  { %285 = vmatprep.subr.bf16.mxu1 %v558_v0  ;;  %v347_v60 = vrot.slane %v327_v57, %v346_v56  ;;  %v352_v63 = vrot.slane %v327_v57, %v351_v58  ;;  %s381_s7 = sshll.u32 %s559_s3, 4  ;;  %s382_s7 = int_to_ptr.vmem [resolvable:$true] %s381_s7 }
  0x30   :  { %s525_s8 = scalar_lea.vmem %s382_s7, 128  ;;  %p530_p2 = scmp.lt.s32.totalorder %s382_s7, %s382_s7 }
  0x31   :  { %145 = vmatpush1.bf16.msra.mxu0 %v435_v6  ;;  %p526_p1 = scmp.ne.s32.totalorder %s382_s7, %s525_s8  ;;  %p531_p3 = scmp.lt.s32.totalorder %s525_s8, %s525_s8 }
  0x32   :  { %146 = vmatprep.subr.bf16.mxu0 %v436_v7  ;;  %286 = vmatpush1.bf16.msra.mxu1 %v447_v13 }
  0x33   :  { %287 = vmatprep.subr.bf16.mxu1 %v558_v0  ;;  %p532_p4 = por %p531_p3, %p530_p2 }
  0x35   :  { %147 = vmatpush1.bf16.msra.mxu0 %v438_v9  ;;  %p533_p5 = pnand %p532_p4, %p526_p1 }
  0x36   :  { %148 = vmatprep.subr.bf16.mxu0 %v439_v11  ;;  %288 = vmatpush1.bf16.msra.mxu1 %v448_v17 }
  0x37   :  { %289 = vmatprep.subr.bf16.mxu1 %v558_v0 }
  0x39   :  { %149 = vmatpush1.bf16.msra.mxu0 %v441_v12 }
  0x3a   :  { %150 = vmatprep.subr.bf16.mxu0 %v442_v14  ;;  %290 = vmatpush1.bf16.msra.mxu1 %v449_v19 }
  0x3b   :  { %291 = vmatprep.subr.bf16.mxu1 %v558_v0 }
  0x3d   :  { %151 = vmatpush1.bf16.msra.mxu0 %v444_v15 }
  0x3e   :  { %292 = vmatpush1.bf16.msra.mxu1 %v450_v20 }
  0x3f   :  { %293 = vmatprep.subr.bf16.mxu1 %v558_v0 }
  0x40   :  { %403 = vmatmul.mubr.msk.bf16.vlgmr.msra.gmra.mxu0 %vm132_vm0, %v59_v18 }
  0x42   :  { %294 = vmatpush1.bf16.msra.mxu1 %v451_v21 }
  0x43   :  { %295 = vmatprep.subr.bf16.mxu1 %v558_v0 }
  0x46   :  { %296 = vmatpush1.bf16.msra.mxu1 %v452_v22 }
  0x47   :  { %305 = vmatprep.subr.bf16.mxu1 %v558_v0 }
  0x4a   :  { %306 = vmatpush2.bf16.msra.mxu1 %v453_v23 }
  0x4b   :  { %307 = vmatprep.subr.bf16.mxu1 %v558_v0 }
  0x4e   :  { %308 = vmatpush2.bf16.msra.mxu1 %v454_v24 }
  0x4f   :  { %309 = vmatprep.subr.bf16.mxu1 %v558_v0 }
  0x52   :  { %310 = vmatpush2.bf16.msra.mxu1 %v455_v25 }
  0x53   :  { %311 = vmatprep.subr.bf16.mxu1 %v558_v0 }
  0x56   :  { %312 = vmatpush2.bf16.msra.mxu1 %v456_v26 }
 0x100   :  { %v170_v27 = vpop.f32.mrf.mxu0 }
 0x101   :  { %v177_v28 = vmax.f32 %v170_v27, 0.0 }
 0x102   :  { %v172_v29 = vpop.f32.mrf.mxu0 }
 0x103   :  { %v178_v30 = vmax.f32 %v172_v29, 0.0  ;;  %v179_v33 = vpack.c.bf16 %v177_v28, %v177_v28 }
 0x104   :  { %v174_v31 = vpop.f32.mrf.mxu0 }
 0x105   :  { %v180_v32 = vpack.c.bf16 %v178_v30, %v178_v30 }
 0x106   :  { %v175_v34 = vpop.f32.mrf.mxu0 }
 0x107   :  { %416 = vmatprep.mubr.msk.bf16.mxu1 %vm277_vm1, %v180_v32 }
 0x108   :  { %314 = vmatmul.mubr.bf16.vlgmr.msra.gmra.mxu1 %v179_v33 }
 0x1c8   :  { %v315_v35 = vpop.f32.mrf.mxu1 }
 0x1c9   :  { %v417_v36 = vmul.f32 -1.442695, %v315_v35 }
 0x1ca   :  { %v317_v37 = vpop.f32.mrf.mxu1 }
 0x1cb   :  { %457 = vpow2.f32 %v417_v36 }
 0x1cc   :  { %v318_v38 = vpop.f32.mrf.mxu1 }
 0x1ce   :  { %v319_v39 = vpop.f32.mrf.mxu1 }
 0x1d8   :  { %v458_v40 = vpop.eup %457 }
 0x1d9   :  { %v324_v41 = vadd.f32 1.0, %v458_v40 }
 0x1db   :  { %459 = vrcp.f32 %v324_v41 }
 0x1e8   :  { %v460_v42 = vpop.eup %459 }
 0x1e9   :  { %v328_v43 = vsel %vm132_vm0, %v460_v42, 0.0  ;;  %v332_v44 = vmul.f32 %v460_v42, %v460_v42 }
 0x1ea   :  { %329 = vadd.xlane.f32.xlu0 %v328_v43 }
 0x1eb   :  { %v333_v45 = vsel %vm132_vm0, %v332_v44, 0.0 }
 0x1ee   :  { %334 = vadd.xlane.f32.xlu0 %v333_v45 }
 0x273   :  { %v330_v46 = vpop.xlane.xlu0 %329 }
 0x274   :  { %v331_v47 = vmul.f32 0.010416667, %v330_v46 }
 0x276   :  { %v337_v49 = vmul.f32 %v331_v47, %v331_v47  ;;  %v340_v59 = vsub.f32 %v460_v42, %v331_v47 }
 0x277   :  { %v335_v48 = vpop.xlane.xlu0 %334 }
 0x278   :  { %v336_v50 = vmul.f32 0.010416667, %v335_v48 }
 0x27a   :  { %v338_v51 = vsub.f32 %v336_v50, %v337_v49 }
 0x27c   :  { %v339_v52 = vmax.f32 %v338_v51, 0.0 }
 0x27e   :  { %v341_v53 = vadd.f32 1e-06, %v339_v52 }
 0x280   :  { %461 = vrsqrt.f32 %v341_v53 }
 0x28d   :  { %v462_v61 = vpop.eup %461 }
 0x28e   :  { %v343_v62 = vmul.f32 %v462_v61, %v340_v59 }
 0x290   :  { %v348_v0 = vmul.f32 %v347_v60, %v343_v62 }
 0x292   :  { %v353_v1 = vadd.f32 %v352_v63, %v348_v0 }
 0x294   :  { %v354_v2 = vmul.f32 %v353_v1, %v594_v16 }
 0x296   :  { %v355_v3 = vadd.f32 %v354_v2, %v594_v16 }
 0x298   :  { %v356_v4 = vsel %vm132_vm0, %v355_v3, 0.0  ;;  %v360_v5 = vmul.f32 %v355_v3, %v355_v3 }
 0x299   :  { %357 = vadd.xlane.f32.xlu1 %v356_v4 }
 0x29a   :  { %v361_v6 = vsel %vm132_vm0, %v360_v5, 0.0 }
 0x29d   :  { %362 = vadd.xlane.f32.xlu1 %v361_v6 }
 0x322   :  { %v358_v7 = vpop.xlane.xlu1 %357 }
 0x323   :  { %v359_v8 = vmul.f32 0.010416667, %v358_v7 }
 0x325   :  { %v365_v10 = vmul.f32 %v359_v8, %v359_v8  ;;  %v368_v15 = vsub.f32 %v355_v3, %v359_v8 }
 0x326   :  { %v363_v9 = vpop.xlane.xlu1 %362 }
 0x327   :  { %v364_v11 = vmul.f32 0.010416667, %v363_v9 }
 0x329   :  { %v366_v12 = vsub.f32 %v364_v11, %v365_v10 }
 0x32b   :  { %v367_v13 = vmax.f32 %v366_v12, 0.0 }
 0x32d   :  { %v369_v14 = vadd.f32 1e-06, %v367_v13 }
 0x32f   :  { %463 = vrsqrt.f32 %v369_v14 }
 0x33c   :  { %v464_v17 = vpop.eup %463 }
 0x33d   :  { %v371_v18 = vmul.f32 %v464_v17, %v368_v15 }
 0x33f   :  { %v372_v16 = vmul.f32 %v371_v18, %v347_v60 }
 0x341   :  { %v373_v19 = vadd.f32 %v372_v16, %v352_v63 }
 0x343   :  { %374 = vst.msk [vmem:[#allocation8] sm:$0xff] %vm132_vm0, %v373_v19 }
 0x344   :  { %536 = shalt.err (!%p533_p5)
}
 0x345   :  { %384 = dma.vmem_to_hbm [thread:$0]  %s382_s7, 128, %s616_s4, [#allocation4]  }
 0x346   :  { %549 = dma.done.wait [#allocation4], 128  }
 0x347   :  { %550 = vsyncadd [#allocation4], 4294967168 }
 0x348   :  { %388 = vsyncpa [#allocation3], 1 }
 0x349   :  { %389 = vsyncpa [#allocation6], 1 }
 0x34a   :  { %390 = vsyncpa [#allocation4], 1 }

</bundles_post_ra>
